<compile_context>
chip_gen: v7x
topology: tpu7x:2x2x1
jax: 0.10.0
libtpu: 0.0.40
codegen_flags: <defaults>
</compile_context>

<pallas_src>
import functools

import numpy as np
import jax
import jax.numpy as jnp
from jax import lax
from jax.experimental import pallas as pl
from jax.experimental.pallas import tpu as pltpu

_LANES = 128
_SUBLANES = 8


def _round_up(x, m):
    return ((x + m - 1) // m) * m


# ----------------------------------------------------------------------------
# Batched init kernel: ONE pallas_call for every default-fill / linspace
# request in the whole config.  `plan` is a static (per-config) tuple, so the
# kernel body is fully unrolled with static slices; only the scalar values go
# through SMEM.
# ----------------------------------------------------------------------------
def _make_batched_init_kernel(plan):
    def kernel(vals_ref, o_ref):
        for req in plan:
            kind = req[0]
            if kind == 'fill':
                _, slot, row_off, rows = req
                # torch semantics: src_val * ones(shape) == full(shape, src_val)
                o_ref[row_off:row_off + rows, :] = jnp.full(
                    (rows, _LANES), vals_ref[slot], jnp.float32)
            else:  # 'linspace' over dim 0, broadcast across trailing dims
                _, lo_slot, hi_slot, row_off, rows, n, cols = req
                low = vals_ref[lo_slot]
                high = vals_ref[hi_slot]
                step = (high - low) / jnp.float32(n - 1 if n > 1 else 1)
                r = lax.broadcasted_iota(jnp.int32, (rows, _LANES), 0)
                l = lax.broadcasted_iota(jnp.int32, (rows, _LANES), 1)
                flat = (r * _LANES + l).astype(jnp.float32)
                if cols == 1:
                    idx = flat
                else:
                    # static cols: flat-index -> row-index of the property
                    idx = jnp.floor((flat + 0.5) * jnp.float32(1.0 / cols))
                o_ref[row_off:row_off + rows, :] = low + idx * step
    return kernel


@functools.lru_cache(maxsize=None)
def _get_batched_init_fn(plan, total_rows):
    """Build (once per static plan) the jitted single-launch pallas_call."""
    call = pl.pallas_call(
        _make_batched_init_kernel(plan),
        out_shape=jax.ShapeDtypeStruct((total_rows, _LANES), jnp.float32),
        in_specs=[pl.BlockSpec(memory_space=pltpu.MemorySpace.SMEM)],
        out_specs=pl.BlockSpec(memory_space=pltpu.MemorySpace.VMEM),
    )
    return jax.jit(call)


# ----------------------------------------------------------------------------
# Deferred values + planner (batches all requests into one kernel launch)
# ----------------------------------------------------------------------------
class _Deferred:
    """Placeholder for a tensor produced by the batched init kernel."""
    __slots__ = ('planner', 'shape', 'numel', 'row_off', 'rows', 'slot',
                 'fill_value', 'value')

    def __init__(self, planner, shape, numel, row_off, rows,
                 slot=None, fill_value=None):
        self.planner = planner
        self.shape = shape
        self.numel = numel
        self.row_off = row_off
        self.rows = rows
        self.slot = slot
        self.fill_value = fill_value
        self.value = None


class _InitPlanner:
    def __init__(self):
        self._reset()

    def _reset(self):
        self._slots = []      # python floats -> SMEM value table
        self._rows = 0        # total rows of the (rows, 128) output buffer
        self._requests = []   # static kernel plan
        self._futures = []    # _Deferred objects to resolve after flush

    def _alloc_slot(self, value):
        self._slots.append(float(value))
        return len(self._slots) - 1

    def _alloc_rows(self, numel):
        rows = _round_up(max((numel + _LANES - 1) // _LANES, 1), _SUBLANES)
        off = self._rows
        self._rows += rows
        return off, rows

    def request_fill(self, value, shape):
        shape = tuple(int(s) for s in shape)
        numel = int(np.prod(shape)) if len(shape) else 1
        slot = self._alloc_slot(value)
        off, rows = self._alloc_rows(numel)
        fut = _Deferred(self, shape, numel, off, rows,
                        slot=slot, fill_value=float(value))
        self._requests.append(('fill', slot, off, rows))
        self._futures.append(fut)
        return fut

    def _slot_for(self, v):
        if isinstance(v, _Deferred):
            if v.slot is not None:
                return v.slot
            if v.fill_value is not None:
                return self._alloc_slot(v.fill_value)
            raise ValueError('unsupported deferred generator argument')
        return self._alloc_slot(float(np.asarray(v, dtype=np.float32).reshape(-1)[0]))

    def request_linspace(self, shape, low, high):
        shape = tuple(int(s) for s in shape)
        numel = int(np.prod(shape)) if len(shape) else 1
        n = shape[0] if len(shape) else 1
        cols = int(np.prod(shape[1:])) if len(shape) > 1 else 1
        lo_slot = self._slot_for(low)
        hi_slot = self._slot_for(high)
        off, rows = self._alloc_rows(numel)
        fut = _Deferred(self, shape, numel, off, rows)
        self._requests.append(('linspace', lo_slot, hi_slot, off, rows, n, cols))
        self._futures.append(fut)
        return fut

    def flush(self):
        if not self._requests:
            self._reset()
            return
        plan = tuple(self._requests)
        vals = jnp.asarray(np.asarray(self._slots, dtype=np.float32))
        buf = _get_batched_init_fn(plan, self._rows)(vals)
        for fut in self._futures:
            seg = buf[fut.row_off:fut.row_off + fut.rows]
            fut.value = seg.reshape(-1)[:fut.numel].reshape(fut.shape)
        self._reset()


# ----------------------------------------------------------------------------
# Registry + substep-function stand-ins (plain Python, no tensor compute)
# ----------------------------------------------------------------------------
class SimpleSubstepFn:
    """Stand-in for registry-provided nn.Module substep functions."""
    def __init__(self, config, input_variables, output_variables, arguments):
        self.config = config
        self.input_variables = input_variables
        self.output_variables = output_variables
        self.arguments = arguments


def linspace_fill_init(initialize_shape, params):
    """Registry 'generator' helper; fused into the batched Pallas kernel."""
    low, high = params['low'], params['high']
    planner = None
    for v in (low, high):
        if isinstance(v, _Deferred):
            planner = v.planner
            break
    if planner is not None:
        return planner.request_linspace(initialize_shape, low, high)
    # Eager path (concrete params): still goes through the same Pallas kernel.
    tmp = _InitPlanner()
    fut = tmp.request_linspace(initialize_shape, low, high)
    tmp.flush()
    return fut.value


class Registry:
    def __init__(self):
        self.initialization_helpers = {'linspace_fill': linspace_fill_init}
        # TODO(synk): graph-construction network_helpers (networkx objects) have no
        # tensor compute and no Pallas equivalent; left empty.
        self.network_helpers = {}
        self.observation_helpers = {'noop_obs': SimpleSubstepFn}
        self.policy_helpers = {'noop_policy': SimpleSubstepFn}
        self.transition_helpers = {'update_wealth': SimpleSubstepFn}
        self.reward_helpers = {}


def _resolve(obj):
    """Replace _Deferred placeholders with their resolved arrays."""
    if isinstance(obj, _Deferred):
        return obj.value
    if isinstance(obj, dict):
        return {k: _resolve(v) for k, v in obj.items()}
    if isinstance(obj, list):
        return [_resolve(v) for v in obj]
    if isinstance(obj, tuple):
        return tuple(_resolve(v) for v in obj)
    if isinstance(obj, SimpleSubstepFn):
        obj.arguments = _resolve(obj.arguments)
        return obj
    return obj


# ----------------------------------------------------------------------------
# Initializer (JAX port of the PyTorch module)
# ----------------------------------------------------------------------------
class Initializer:
    def __init__(self, config, registry):
        self.config = config
        self.registry = registry
        self.device = self.config['simulation_metadata']['device']  # informational
        self.state = {}
        for key in self.config['state'].keys():
            self.state[key] = {}
        self.fixed_parameters, self.learnable_parameters = {}, {}
        # nn.ModuleDict -> plain dicts
        self.observation_function = {}
        self.policy_function = {}
        self.transition_function = {}
        self.reward_function = {}
        self._planner = _InitPlanner()

    # ---- property initialization -------------------------------------------
    def _initialize_from_default(self, src_val, shape):
        processed_shape = shape
        if type(src_val) == str:
            return src_val
        elif type(src_val) == list:
            return jnp.asarray(src_val)
        shape_t = tuple(int(s) for s in processed_shape)
        numel = int(np.prod(shape_t)) if len(shape_t) else 1
        if numel == 0:
            return jnp.zeros(shape_t, jnp.float32)
        # hot path: scalar * ones(shape) (f32, like torch) -> deferred to the
        # single batched Pallas fill kernel.
        return self._planner.request_fill(src_val, shape_t)

    def _initialize_from_generator(self, initializer_object, initialize_shape, name_root):
        function = initializer_object['generator']
        params = {}
        for argument in initializer_object['arguments'].keys():
            arg_object = initializer_object['arguments'][argument]
            arg_name = f'{name_root}_{argument}'
            arg_learnable, arg_shape = arg_object['learnable'], arg_object['shape']
            arg_init_func = arg_object['initialization_function']
            if arg_init_func is None:
                arg_value = self._initialize_from_default(arg_object['value'], arg_shape)
            else:
                print('!!! dynamic argument are not currently supported. Setup from fixed value !!!')
                return
            params[argument] = arg_value
            if arg_learnable:
                self.learnable_parameters[arg_name] = arg_value
            else:
                self.fixed_parameters[arg_name] = arg_value
        init_value = self.registry.initialization_helpers[function](initialize_shape, params)
        return init_value

    def _initialize_property(self, property_object, property_key):
        property_shape = property_object['shape']
        property_is_learnable = property_object['learnable']
        property_initializer = property_object['initialization_function']
        if property_initializer is None:
            property_value = self._initialize_from_default(property_object['value'], property_shape)
        else:
            property_value = self._initialize_from_generator(
                property_initializer, property_shape, property_key)
        if property_is_learnable:
            self.learnable_parameters[property_key] = property_value
        else:
            self.fixed_parameters[property_key] = property_value
        return property_value

    # ---- substep-function argument parsing ----------------------------------
    def _parse_function(self, function_object, name_root):
        input_variables = function_object['input_variables']
        output_variables = function_object['output_variables']
        arguments = function_object['arguments']
        learnable_args, fixed_args = {}, {}
        if arguments is not None:
            for argument in arguments:
                arg_name = f'{name_root}_{argument}'
                arg_object = arguments[argument]
                arg_function = arg_object['initialization_function']
                arg_learnable = arg_object['learnable']
                arg_shape = arg_object['shape']
                if arg_function is None:
                    arg_value = self._initialize_from_default(arg_object['value'], arg_shape)
                else:
                    arg_value = self._initialize_from_generator(arg_function, arg_shape, name_root=arg_name)
                if arg_learnable:
                    self.learnable_parameters[arg_name] = arg_value
                    learnable_args[argument] = arg_value
                else:
                    self.fixed_parameters[arg_name] = arg_value
                    fixed_args[argument] = arg_value
        arguments = {'learnable': learnable_args, 'fixed': fixed_args}
        return input_variables, output_variables, arguments

    # ---- state construction --------------------------------------------------
    def environment(self, key='environment'):
        if self.config['state'][key] is None:
            print('Skipping.. ', key)
            return
        for prop in self.config['state'][key].keys():
            property_object = self.config['state'][key][prop]
            self.state[key][prop] = self._initialize_property(
                property_object, property_key=f'{key}_{prop}')

    def agents_objects(self, key='agents'):
        if self.config['state'][key] is None:
            print('Skipping: ', key)
            return
        for instance_type in self.config['state'][key].keys():
            if instance_type == 'metadata':
                continue
            self.state[key][instance_type] = {}
            instance_properties = self.config['state'][key][instance_type]['properties']
            if instance_properties is None:
                continue
            for prop in instance_properties.keys():
                property_object = instance_properties[prop]
                self.state[key][instance_type][prop] = self._initialize_property(
                    property_object, property_key=f'{key}_{instance_type}_{prop}')

    def network(self, key='network'):
        if self.config['state'][key] is None:
            print('Skipping.. ', key)
            return
        for interaction_type in self.config['state'][key].keys():
            self.state[key][interaction_type] = {}
            if self.config['state'][key][interaction_type] is None:
                continue
            for contact_network in self.config['state'][key][interaction_type].keys():
                self.state[key][interaction_type][contact_network] = {}
                network_type = self.config['state'][key][interaction_type][contact_network]['type']
                params = self.config['state'][key][interaction_type][contact_network]['arguments']
                graph, (edge_list, attr_list) = self.registry.network_helpers[network_type](params)
                self.state[key][interaction_type][contact_network]['graph'] = graph
                self.state[key][interaction_type][contact_network]['adjacency_matrix'] = (
                    edge_list, attr_list)

    def simulator(self):
        self.environment()
        self.agents_objects(key='agents')
        self.agents_objects(key='objects')
        self.network()
        # nn.ParameterDict -> plain dict of learnable jnp arrays
        self.parameters = dict(self.learnable_parameters)

    def substeps(self):
        for substep in self.config['substeps'].keys():
            active_agents = self.config['substeps'][substep]['active_agents']
            self.observation_function[substep] = {}
            self.policy_function[substep] = {}
            self.transition_function[substep] = {}
            for agent_type in active_agents:
                agent_observations = self.config['substeps'][substep]['observation'][agent_type]
                self.observation_function[substep][agent_type] = {}
                if agent_observations is not None:
                    for obs_func in agent_observations:
                        iv, ov, args = self._parse_function(
                            agent_observations[obs_func],
                            name_root=f'{agent_type}_observation_{obs_func}')
                        self.observation_function[substep][agent_type][obs_func] = \
                            self.registry.observation_helpers[obs_func](self.config, iv, ov, args)
                agent_policies = self.config['substeps'][substep]['policy'][agent_type]
                self.policy_function[substep][agent_type] = {}
                if agent_policies is not None:
                    for policy_func in agent_policies:
                        iv, ov, args = self._parse_function(
                            agent_policies[policy_func],
                            name_root=f'{agent_type}_policy_{policy_func}')
                        self.policy_function[substep][agent_type][policy_func] = \
                            self.registry.policy_helpers[policy_func](self.config, iv, ov, args)
            substep_transitions = self.config['substeps'][substep]['transition']
            self.transition_function[substep] = {}
            for transition_func in substep_transitions:
                iv, ov, args = self._parse_function(
                    substep_transitions[transition_func],
                    name_root=f'_transition_{transition_func}')
                self.transition_function[substep][transition_func] = \
                    self.registry.transition_helpers[transition_func](self.config, iv, ov, args)

    def _resolve_all(self):
        self.state = _resolve(self.state)
        self.fixed_parameters = _resolve(self.fixed_parameters)
        self.learnable_parameters = _resolve(self.learnable_parameters)
        self.parameters = _resolve(self.parameters)
        self.observation_function = _resolve(self.observation_function)
        self.policy_function = _resolve(self.policy_function)
        self.transition_function = _resolve(self.transition_function)
        self.reward_function = _resolve(self.reward_function)

    def initialize(self):
        self.state['current_step'] = 0
        self.state['current_substep'] = '0'
        self.simulator()
        self.substeps()
        # Execute ALL planned fills / generators in ONE batched Pallas launch,
        # then replace placeholders with the resolved device arrays.
        self._planner.flush()
        self._resolve_all()

    def forward(self):
        self.initialize()


# ----------------------------------------------------------------------------
# Main
# ----------------------------------------------------------------------------
if __name__ == "__main__":
    # Deterministic setup (module initialization is deterministic by construction;
    # the PRNGKey is only used to show deterministic seeding as required).
    _ = jax.random.PRNGKey(0)

    N_AGENTS = 16
    config = {
        'simulation_metadata': {'device': 'tpu'},
        'state': {
            'environment': {
                'temperature': {'name': 'temperature', 'shape': [8, 16], 'dtype': 'float',
                                'learnable': False, 'initialization_function': None, 'value': 25.0},
                'bounds': {'name': 'bounds', 'shape': [2], 'dtype': 'float',
                           'learnable': False, 'initialization_function': None,
                           'value': [0.0, 100.0]},
            },
            'agents': {
                'citizens': {
                    'number': N_AGENTS,
                    'properties': {
                        'age': {'name': 'age', 'shape': [N_AGENTS, 1], 'dtype': 'float',
                                'learnable': False, 'value': None,
                                'initialization_function': {
                                    'generator': 'linspace_fill',
                                    'arguments': {
                                        'low': {'learnable': False, 'shape': [1],
                                                'initialization_function': None, 'value': 0.0},
                                        'high': {'learnable': True, 'shape': [1],
                                                 'initialization_function': None, 'value': 80.0},
                                    }}},
                        'wealth': {'name': 'wealth', 'shape': [N_AGENTS, 1], 'dtype': 'float',
                                   'learnable': True, 'initialization_function': None,
                                   'value': 10.0},
                    }},
            },
            'objects': None,
            'network': None,
        },
        'substeps': {
            '0': {
                'active_agents': ['citizens'],
                'observation': {'citizens': None},
                'policy': {'citizens': None},
                'transition': {
                    'update_wealth': {
                        'generator': 'update_wealth',
                        'input_variables': {'w': 'agents/citizens/wealth'},
                        'output_variables': ['wealth'],
                        'arguments': {
                            'rate': {'learnable': True, 'shape': [1, 1],
                                     'initialization_function': None, 'value': 0.05},
                        }}},
            }
        },
    }

    registry = Registry()
    initializer = Initializer(config, registry)
    initializer.forward()

    # Block on every device array produced by the kernel.
    for leaf in jax.tree_util.tree_leaves(initializer.state) + \
               jax.tree_util.tree_leaves(initializer.parameters):
        if isinstance(leaf, jax.Array):
            jax.block_until_ready(leaf)

    # Sanity checks against PyTorch semantics.
    temp = initializer.state['environment']['temperature']
    assert temp.shape == (8, 16) and float(temp[0, 0]) == 25.0
    bounds = initializer.state['environment']['bounds']
    assert bounds.shape == (2,) and float(bounds[1]) == 100.0
    age = initializer.state['agents']['citizens']['age']
    assert age.shape == (N_AGENTS, 1)
    assert abs(float(age[0, 0]) - 0.0) < 1e-5 and abs(float(age[-1, 0]) - 80.0) < 1e-4
    wealth = initializer.state['agents']['citizens']['wealth']
    assert wealth.shape == (N_AGENTS, 1) and float(wealth[3, 0]) == 10.0
    rate = initializer.fixed_parameters.get('_transition_update_wealth_rate',
                                            initializer.learnable_parameters['_transition_update_wealth_rate'])
    assert rate.shape == (1, 1) and abs(float(rate[0, 0]) - 0.05) < 1e-7
    assert 'agents_citizens_wealth' in initializer.parameters

    print("KERNEL_OK")
</pallas_src>

<mosaic_0001>
module attributes {stable_mosaic.version = 11 : i64} {
  func.func @kernel(%arg0: memref<5xf32, #tpu.memory_space<smem>>, %arg1: memref<48x128xf32, #tpu.memory_space<vmem>>) attributes {dimension_semantics = [], scalar_prefetch = 0 : i64, scratch_operands = 0 : i64, tpu.core_type = #tpu.core_type<tc>} {
    %c0 = arith.constant 0 : index
    %0 = memref.load %arg0[%c0] : memref<5xf32, #tpu.memory_space<smem>>
    %1 = vector.broadcast %0 : f32 to vector<8x128xf32>
    %c0_0 = arith.constant 0 : index
    %c0_1 = arith.constant 0 : index
    %2 = vector.load %arg1[%c0_0, %c0_1] : memref<48x128xf32, #tpu.memory_space<vmem>>, vector<8x128xf32>
    tpu.vector_store %arg1[%c0_0, %c0_1], %1 {strides = array<i32>} : memref<48x128xf32, #tpu.memory_space<vmem>>, vector<8x128xf32>,
    %c1 = arith.constant 1 : index
    %3 = memref.load %arg0[%c1] : memref<5xf32, #tpu.memory_space<smem>>
    %4 = vector.broadcast %3 : f32 to vector<8x128xf32>
    %c8 = arith.constant 8 : index
    %c0_2 = arith.constant 0 : index
    %5 = vector.load %arg1[%c8, %c0_2] : memref<48x128xf32, #tpu.memory_space<vmem>>, vector<8x128xf32>
    tpu.vector_store %arg1[%c8, %c0_2], %4 {strides = array<i32>} : memref<48x128xf32, #tpu.memory_space<vmem>>, vector<8x128xf32>,
    %c2 = arith.constant 2 : index
    %6 = memref.load %arg0[%c2] : memref<5xf32, #tpu.memory_space<smem>>
    %7 = vector.broadcast %6 : f32 to vector<8x128xf32>
    %c16 = arith.constant 16 : index
    %c0_3 = arith.constant 0 : index
    %8 = vector.load %arg1[%c16, %c0_3] : memref<48x128xf32, #tpu.memory_space<vmem>>, vector<8x128xf32>
    tpu.vector_store %arg1[%c16, %c0_3], %7 {strides = array<i32>} : memref<48x128xf32, #tpu.memory_space<vmem>>, vector<8x128xf32>,
    %c1_4 = arith.constant 1 : index
    %9 = memref.load %arg0[%c1_4] : memref<5xf32, #tpu.memory_space<smem>>
    %c2_5 = arith.constant 2 : index
    %10 = memref.load %arg0[%c2_5] : memref<5xf32, #tpu.memory_space<smem>>
    %11 = arith.subf %10, %9 : f32
    %cst = arith.constant 1.500000e+01 : f32
    %12 = arith.divf %11, %cst : f32
    %13 = tpu.iota {dimensions = array<i32: 0>} : vector<8x128xi32>
    %14 = tpu.iota {dimensions = array<i32: 1>} : vector<8x128xi32>
    %c128_i32 = arith.constant 128 : i32
    %15 = vector.broadcast %c128_i32 : i32 to vector<8x128xi32>
    %16 = arith.muli %13, %15 : vector<8x128xi32>
    %17 = arith.addi %16, %14 : vector<8x128xi32>
    %18 = arith.sitofp %17 : vector<8x128xi32> to vector<8x128xf32>
    %19 = vector.broadcast %12 : f32 to vector<8x128xf32>
    %20 = arith.mulf %18, %19 : vector<8x128xf32>
    %21 = vector.broadcast %9 : f32 to vector<8x128xf32>
    %22 = arith.addf %21, %20 : vector<8x128xf32>
    %c24 = arith.constant 24 : index
    %c0_6 = arith.constant 0 : index
    %23 = vector.load %arg1[%c24, %c0_6] : memref<48x128xf32, #tpu.memory_space<vmem>>, vector<8x128xf32>
    tpu.vector_store %arg1[%c24, %c0_6], %22 {strides = array<i32>} : memref<48x128xf32, #tpu.memory_space<vmem>>, vector<8x128xf32>,
    %c3 = arith.constant 3 : index
    %24 = memref.load %arg0[%c3] : memref<5xf32, #tpu.memory_space<smem>>
    %25 = vector.broadcast %24 : f32 to vector<8x128xf32>
    %c32 = arith.constant 32 : index
    %c0_7 = arith.constant 0 : index
    %26 = vector.load %arg1[%c32, %c0_7] : memref<48x128xf32, #tpu.memory_space<vmem>>, vector<8x128xf32>
    tpu.vector_store %arg1[%c32, %c0_7], %25 {strides = array<i32>} : memref<48x128xf32, #tpu.memory_space<vmem>>, vector<8x128xf32>,
    %c4 = arith.constant 4 : index
    %27 = memref.load %arg0[%c4] : memref<5xf32, #tpu.memory_space<smem>>
    %28 = vector.broadcast %27 : f32 to vector<8x128xf32>
    %c40 = arith.constant 40 : index
    %c0_8 = arith.constant 0 : index
    %29 = vector.load %arg1[%c40, %c0_8] : memref<48x128xf32, #tpu.memory_space<vmem>>, vector<8x128xf32>
    tpu.vector_store %arg1[%c40, %c0_8], %28 {strides = array<i32>} : memref<48x128xf32, #tpu.memory_space<vmem>>, vector<8x128xf32>,
    return
  }
}

</mosaic_0001>

<bundles_post_ra>
// kernel: tpu_custom_call.1
= control target key start
LH: loop header
LB: loop body
LE: loop exit
PB: predicated region body
PF: predicated region fallthrough
CT: control target
= control target key end

     0   :  { %6 = vsyncpa [#allocation4], 0  ;;  %s154_s0 = inlined_call_operand.hbm [shape: f32[5], index: 0, kind: input, shape index: {}]   ;;  %s155_s1 = inlined_call_operand.hbm [shape: f32[48,128], index: 1, kind: output, shape index: {}]  }
   0x1   :  { %7 = vsyncpa [#allocation3], 0  ;;  %s80_s8 = scalar_lea.hbm %s154_s0, 16 }
   0x2   :  { %p81_p0 = scmp.ne.s32.totalorder %s154_s0, %s80_s8  ;;  %p84_p1 = scmp.lt.u32.totalorder %s80_s8, %s154_s0 }
   0x4   :  { %p86_p2 = pnand %p84_p1, %p81_p0 }
   0x6   :  { %89 = shalt.err (!%p86_p2)
}
   0x7   :  { %s116_s13 = smov [#allocation2]  }
   0x8   :  { %15 = dma.hbm_to_smem %s154_s0, 16, %s116_s13, [#allocation4]  }
   0x9   :  { %112 = dma.done.wait [#allocation4], 16  }
   0xa   :  { %113 = vsyncadd [#allocation4], 4294967280 }
   0xb   :  { %19 = sfence }
   0xc   :  { %s20_s16 = sld [smem:[#allocation2]]  ;;  %s70_s17 = sld [smem:[#allocation2 + $0x1]]  ;;  %v35_v0 = vlaneseq }
   0xd   :  { %s71_s18 = sld [smem:[#allocation2 + $0x2]]  ;;  %s74_s19 = sld [smem:[#allocation2 + $0x3]] }
   0xe   :  { %v36_v1 = vshrl.u32 %v35_v0, 7  ;;  %v38_v2 = vand.u32 127, %v35_v0  ;;  %s75_s20 = sld [smem:[#allocation2 + $0x4]]  ;;  %s117_s22 = smov [#allocation5]  }
   0xf   :  { %s58_s23 = sshll.u32 %s117_s22, 4  ;;  %s59_s23 = int_to_ptr.vmem [resolvable:$true] %s58_s23 }
  0x10   :  { %v39_v3 = vmul.u32 128, %v36_v1  ;;  %s90_s24 = scalar_lea.vmem %s59_s23, 768  ;;  %p95_p4 = scmp.lt.s32.totalorder %s59_s23, %s59_s23 }
  0x11   :  { %p91_p3 = scmp.ne.s32.totalorder %s59_s23, %s90_s24  ;;  %p96_p5 = scmp.lt.s32.totalorder %s90_s24, %s90_s24 }
  0x12   :  { %v21_v4 = vstv %s20_s16  ;;  %v24_v5 = vstv %s70_s17  ;;  %v40_v6 = vadd.s32 %v39_v3, %v38_v2 }
  0x13   :  { %22 = vst [vmem:[#allocation5] sm:$0xff] %v21_v4  ;;  %25 = vst [vmem:[#allocation5 + $0x8] sm:$0xff] %v24_v5  ;;  %v27_v7 = vstv %s71_s18  ;;  %s31_s21 = ssub.f32 %s71_s18, %s70_s17  ;;  %v48_v8 = vstv %s74_s19  ;;  %p97_p6 = por %p96_p5, %p95_p4 }
  0x14   :  { %28 = vst [vmem:[#allocation5 + $0x10] sm:$0xff] %v27_v7  ;;  %v41_v9 = vcvt.s32.f32 %v40_v6  ;;  %49 = vst [vmem:[#allocation5 + $0x20] sm:$0xff] %v48_v8  ;;  %v51_v10 = vstv %s75_s20 }
  0x15   :  { %s34_s0 = smul.f32 0.06666667, %s31_s21  ;;  %52 = vst [vmem:[#allocation5 + $0x28] sm:$0xff] %v51_v10  ;;  %p98_p7 = pnand %p97_p6, %p91_p3 }
  0x17   :  { %v42_v11 = vstv %s34_s0 }
  0x18   :  { %v43_v12 = vmul.f32 %v42_v11, %v41_v9 }
  0x1a   :  { %v45_v13 = vadd.f32 %v43_v12, %v24_v5 }
  0x1c   :  { %46 = vst [vmem:[#allocation5 + $0x18] sm:$0xff] %v45_v13 }
  0x1d   :  { %101 = shalt.err (!%p98_p7)
}
  0x1e   :  { %s102_s27 = scalar_lea.hbm %s155_s1, 768 }
  0x1f   :  { %p103_p8 = scmp.ne.s32.totalorder %s155_s1, %s102_s27  ;;  %p106_p9 = scmp.lt.u32.totalorder %s102_s27, %s155_s1 }
  0x21   :  { %p108_p10 = pnand %p106_p9, %p103_p8 }
  0x23   :  { %111 = shalt.err (!%p108_p10)
}
  0x24   :  { %s118_s3 = smov 128   ;;  %s119_s4 = smov 8  }
  0x25   :  { %64 = dma.vmem_to_hbm [thread:$0]  %s59_s23, 768, %s155_s1, [#allocation3], %s118_s3, %s118_s3, %s119_s4  }
  0x26   :  { %114 = dma.done.wait [#allocation3], 768  }
  0x27   :  { %115 = vsyncadd [#allocation3], 4294966528 }
  0x28   :  { %68 = vsyncpa [#allocation3], 1 }
  0x29   :  { %69 = vsyncpa [#allocation4], 1 }

</bundles_post_ra>
